<compile_context>
chip_gen: v5e
topology: v5e:2x2
jax: 0.10.0
libtpu: 0.0.40
codegen_flags: <defaults>
</compile_context>

<pallas_src>
import functools

import jax
import jax.numpy as jnp
from jax.experimental import pallas as pl
from jax.experimental.pallas import tpu as pltpu

SCALE = 0.125
_NEG_LARGE = -1e30      # finite "minus infinity" for kv padding
_M_INIT = -1e30         # finite running-max init (avoids exp(-inf - -inf) NaN)


# --------------------------------------------------------------------------- #
# Tiling / budgeting helpers
# --------------------------------------------------------------------------- #
def _round_up(x, m):
    return (x + m - 1) // m * m


def _vmem_budgets():
    """(working-set budget incl. 2x buffering, vmem_limit_bytes) for this chip."""
    cap = 64 * 1024 * 1024                      # conservative (v7x-sized) fallback
    try:
        cap = int(pltpu.get_tpu_info().vmem_capacity_bytes)
    except Exception:
        pass
    cap = min(max(cap, 32 * 1024 * 1024), 128 * 1024 * 1024)
    budget = min(cap // 2, 64 * 1024 * 1024)    # v7x: 32 MiB, v5e/v6e: 64 MiB
    limit = min(int(cap * 0.8), budget + 24 * 1024 * 1024)
    return budget, limit


def _choose_q_tiling(Lq):
    """Returns (Lq_pad, tq). Full extent for short sequences, 128/256 tiles else."""
    if Lq <= 512:
        return Lq, Lq
    Lq_pad = _round_up(Lq, 128)
    for tq in (256, 128):
        if Lq_pad % tq == 0:
            return Lq_pad, tq
    return Lq_pad, 128


def _choose_kv_tiling(Lk):
    """Returns (Lk_pad, tk). tk == Lk_pad means a single kv step (fast path)."""
    if Lk <= 512:
        return Lk, Lk
    Lk_pad = _round_up(Lk, 128)
    for tk in (512, 256, 128):
        if Lk_pad % tk == 0:
            return Lk_pad, tk
    return Lk_pad, 128


# --------------------------------------------------------------------------- #
# Kernels
# --------------------------------------------------------------------------- #
def _write_out(o_ref, o_f32, ev, wide_out):
    """Store (G, tq, Ev) f32 results, folding heads into lanes when wide_out."""
    if wide_out:
        for g in range(o_f32.shape[0]):            # static unroll, static lane slices
            o_ref[0, :, g * ev:(g + 1) * ev] = o_f32[g].astype(o_ref.dtype)
    else:
        o_ref[...] = o_f32.astype(o_ref.dtype)


def _sdpa_single_kernel(q_ref, k_ref, v_ref, m_ref, o_ref, *,
                        tq, ev, wide_out, mask_resident):
    """Single kv step: plain softmax, no online-softmax scratch/rescale."""
    if mask_resident:
        qi = pl.program_id(1)
        m = m_ref[0, pl.ds(pl.multiple_of(qi * tq, tq), tq), :]      # (tq, tk)
    else:
        m = m_ref[...]                                               # (G|1, tq, tk)

    # Scale folded into Q (exact: 0.125 is a power of two), f32 accumulation.
    s = jnp.einsum("gqe,gke->gqk", q_ref[...] * SCALE, k_ref[...],
                   preferred_element_type=jnp.float32)
    s = s + m.astype(jnp.float32)

    mx = jnp.max(s, axis=-1, keepdims=True)
    p = jnp.exp(s - mx)
    l = jnp.sum(p, axis=-1, keepdims=True)
    o = jnp.einsum("gqk,gkv->gqv", p.astype(v_ref.dtype), v_ref[...],
                   preferred_element_type=jnp.float32)
    o = o * pl.reciprocal(l, approx=True)
    _write_out(o_ref, o, ev, wide_out)


def _sdpa_flash_kernel(q_ref, k_ref, v_ref, m_ref, o_ref,
                       m_sc, l_sc, acc_sc, *,
                       tq, ev, wide_out, mask_resident):
    """Flash-style online softmax over the kv ('arbitrary') grid axis."""
    kv = pl.program_id(2)

    @pl.when(kv == 0)
    def _init():
        m_sc[...] = jnp.full_like(m_sc, _M_INIT)
        l_sc[...] = jnp.zeros_like(l_sc)
        acc_sc[...] = jnp.zeros_like(acc_sc)

    if mask_resident:
        qi = pl.program_id(1)
        # Resident mask is stored kv-tile-major: (kv_steps, Lq_pad, tk).
        m = m_ref[kv, pl.ds(pl.multiple_of(qi * tq, tq), tq), :]     # (tq, tk)
    else:
        m = m_ref[...]                                               # (G|1, tq, tk)

    s = jnp.einsum("gqe,gke->gqk", q_ref[...] * SCALE, k_ref[...],
                   preferred_element_type=jnp.float32)
    s = s + m.astype(jnp.float32)

    m_prev = m_sc[...]
    m_new = jnp.maximum(m_prev, jnp.max(s, axis=-1, keepdims=True))
    alpha = jnp.exp(m_prev - m_new)
    p = jnp.exp(s - m_new)
    l_sc[...] = alpha * l_sc[...] + jnp.sum(p, axis=-1, keepdims=True)
    acc_sc[...] = alpha * acc_sc[...] + jnp.einsum(
        "gqk,gkv->gqv", p.astype(v_ref.dtype), v_ref[...],
        preferred_element_type=jnp.float32)
    m_sc[...] = m_new

    @pl.when(kv == pl.num_programs(2) - 1)
    def _finalize():
        inv_l = pl.reciprocal(l_sc[...], approx=True)
        _write_out(o_ref, acc_sc[...] * inv_l, ev, wide_out)


# --------------------------------------------------------------------------- #
# Wrapper
# --------------------------------------------------------------------------- #
def sdpa_pallas(query, key, value, attention_mask, *, compute_dtype=jnp.bfloat16):
    """scaled_dot_product_attention(q, k, v, attn_mask=mask, scale=0.125)."""
    B, H, Lq, E = query.shape
    Lk = key.shape[2]
    Ev = value.shape[3]
    BH = B * H
    out_dtype = query.dtype

    # Operand precision for the MXU (f32 accumulation regardless).
    op_dtype = jnp.dtype(query.dtype) if compute_dtype is None else jnp.dtype(compute_dtype)
    op_isz = op_dtype.itemsize
    out_isz = jnp.dtype(out_dtype).itemsize

    q = query.reshape(BH, Lq, E).astype(op_dtype)
    k = key.reshape(BH, Lk, E).astype(op_dtype)
    v = value.reshape(BH, Lk, Ev).astype(op_dtype)

    # ---- mask normalisation (no broadcast-materialisation across heads) ----
    m = jnp.asarray(attention_mask)
    if m.dtype == jnp.bool_:
        # torch boolean semantics: True = keep, False = mask out.
        m = jnp.where(m, 0.0, -jnp.inf).astype(jnp.float32)
    m = m.reshape((1,) * (4 - m.ndim) + m.shape)
    if m.shape[2] != Lq or m.shape[3] != Lk:
        m = jnp.broadcast_to(m, m.shape[:2] + (Lq, Lk))
    if m.shape[:2] == (1, 1):
        m = m.reshape(1, Lq, Lk)
        mask_per_head = False
    else:
        # Partial broadcasts (e.g. (B,1,Lq,Lk)) are rare -> materialise per head.
        m = jnp.broadcast_to(m, (B, H, Lq, Lk)).reshape(BH, Lq, Lk)
        mask_per_head = True
    m = m.astype(op_dtype)
    mask_isz = jnp.dtype(m.dtype).itemsize

    # ---- tiling (pad awkward extents instead of huge single blocks) --------
    Lq_pad, tq = _choose_q_tiling(Lq)
    Lk_pad, tk = _choose_kv_tiling(Lk)
    single_pass = (tk == Lk_pad)
    q_steps = Lq_pad // tq
    kv_steps = Lk_pad // tk

    if Lq_pad != Lq or Lk_pad != Lk:
        q = jnp.pad(q, ((0, 0), (0, Lq_pad - Lq), (0, 0)))
        k = jnp.pad(k, ((0, 0), (0, Lk_pad - Lk), (0, 0)))
        v = jnp.pad(v, ((0, 0), (0, Lk_pad - Lk), (0, 0)))
        # Padded kv columns get a large finite negative (self-correcting in the
        # online softmax); padded q rows are sliced off at the end.
        m = jnp.pad(m, ((0, 0), (0, Lq_pad - Lq), (0, Lk_pad - Lk)),
                    constant_values=((0, 0), (0, 0), (0, _NEG_LARGE)))

    # ---- VMEM budget (generation aware) and shared-mask residency ----------
    budget, vmem_limit = _vmem_budgets()
    mask_resident = (not mask_per_head) and \
        (2 * Lq_pad * Lk_pad * mask_isz <= budget // 4)
    if mask_resident:
        # kv-tile-major layout: kernel indexes leading dim (kv step) and slices
        # sublanes (q rows) only; no dynamic lane slicing.
        m = m.reshape(Lq_pad, kv_steps, tk).transpose(1, 0, 2)   # (kv_steps, Lq_pad, tk)

    # ---- head-group size G --------------------------------------------------
    def fits(g):
        blocks = g * (tq * E + tk * E + tk * Ev) * op_isz + g * tq * Ev * out_isz
        if mask_resident:
            mask_b = 2 * Lq_pad * Lk_pad * mask_isz
        else:
            mask_b = 2 * (g if mask_per_head else 1) * tq * tk * mask_isz
        total = 2 * blocks + mask_b                       # 2x: double-buffered blocks
        if not single_pass:
            total += 4 * g * tq * (Ev + 2)                # f32 m/l/acc scratch (1x)
        total += 4 * g * tq * (2 * tk + 2 * Ev)           # f32 s/p + rescale temporaries
        return total <= budget

    max_g = BH
    if BH >= 2 and q_steps < 2:
        # Keep >= 2 iterations on the "parallel" axes so both v7x TCs get work.
        max_g = max(1, BH // 2)

    G = 1
    g_aligned = None
    for g in range(1, max_g + 1):
        if BH % g or not fits(g):
            continue
        G = g
        if (g * Ev) % 128 == 0:
            g_aligned = g
    if g_aligned is not None:
        G = g_aligned
    grid0 = BH // G

    # Lane-dense (head-folded) output when Ev alone is not a lane multiple.
    wide_out = (Ev % 128 != 0) and ((G * Ev) % 128 == 0)

    # ---- specs ---------------------------------------------------------------
    if single_pass:
        grid = (grid0, q_steps)
        q_spec = pl.BlockSpec((G, tq, E), lambda g, qi: (g, qi, 0))
        k_spec = pl.BlockSpec((G, tk, E), lambda g, qi: (g, 0, 0))
        v_spec = pl.BlockSpec((G, tk, Ev), lambda g, qi: (g, 0, 0))
        if mask_resident:
            m_spec = pl.BlockSpec((kv_steps, Lq_pad, tk), lambda g, qi: (0, 0, 0))
        elif mask_per_head:
            m_spec = pl.BlockSpec((G, tq, tk), lambda g, qi: (g, qi, 0))
        else:
            m_spec = pl.BlockSpec((1, tq, tk), lambda g, qi: (0, qi, 0))
        if wide_out:
            out_shape = jax.ShapeDtypeStruct((grid0, Lq_pad, G * Ev), out_dtype)
            o_spec = pl.BlockSpec((1, tq, G * Ev), lambda g, qi: (g, qi, 0))
        else:
            out_shape = jax.ShapeDtypeStruct((BH, Lq_pad, Ev), out_dtype)
            o_spec = pl.BlockSpec((G, tq, Ev), lambda g, qi: (g, qi, 0))
        kernel = functools.partial(_sdpa_single_kernel, tq=tq, ev=Ev,
                                   wide_out=wide_out, mask_resident=mask_resident)
        scratch = []
        dims = ("parallel", "parallel")
    else:
        grid = (grid0, q_steps, kv_steps)
        q_spec = pl.BlockSpec((G, tq, E), lambda g, qi, ki: (g, qi, 0))
        k_spec = pl.BlockSpec((G, tk, E), lambda g, qi, ki: (g, ki, 0))
        v_spec = pl.BlockSpec((G, tk, Ev), lambda g, qi, ki: (g, ki, 0))
        if mask_resident:
            m_spec = pl.BlockSpec((kv_steps, Lq_pad, tk), lambda g, qi, ki: (0, 0, 0))
        elif mask_per_head:
            m_spec = pl.BlockSpec((G, tq, tk), lambda g, qi, ki: (g, qi, ki))
        else:
            m_spec = pl.BlockSpec((1, tq, tk), lambda g, qi, ki: (0, qi, ki))
        if wide_out:
            out_shape = jax.ShapeDtypeStruct((grid0, Lq_pad, G * Ev), out_dtype)
            o_spec = pl.BlockSpec((1, tq, G * Ev), lambda g, qi, ki: (g, qi, 0))
        else:
            out_shape = jax.ShapeDtypeStruct((BH, Lq_pad, Ev), out_dtype)
            o_spec = pl.BlockSpec((G, tq, Ev), lambda g, qi, ki: (g, qi, 0))
        kernel = functools.partial(_sdpa_flash_kernel, tq=tq, ev=Ev,
                                   wide_out=wide_out, mask_resident=mask_resident)
        scratch = [pltpu.VMEM((G, tq, 1), jnp.float32),    # running max
                   pltpu.VMEM((G, tq, 1), jnp.float32),    # running sum
                   pltpu.VMEM((G, tq, Ev), jnp.float32)]   # accumulator
        dims = ("parallel", "parallel", "arbitrary")

    out = pl.pallas_call(
        kernel,
        out_shape=out_shape,
        grid_spec=pltpu.PrefetchScalarGridSpec(
            num_scalar_prefetch=0,
            grid=grid,
            in_specs=[q_spec, k_spec, v_spec, m_spec],
            out_specs=o_spec,
            scratch_shapes=scratch,
        ),
        compiler_params=pltpu.CompilerParams(
            dimension_semantics=dims,
            vmem_limit_bytes=vmem_limit,
        ),
    )(q, k, v, m)

    if wide_out:
        out = (out.reshape(grid0, Lq_pad, G, Ev)
                  .transpose(0, 2, 1, 3)
                  .reshape(BH, Lq_pad, Ev))
    out = out[:, :Lq, :]
    return out.reshape(B, H, Lq, Ev)


def sdpa_ref(query, key, value, attention_mask):
    """Pure-JAX f32 reference matching torch SDPA (additive mask, scale=0.125)."""
    s = jnp.einsum("bhqe,bhke->bhqk", query.astype(jnp.float32),
                   key.astype(jnp.float32)) * SCALE
    s = s + attention_mask.astype(jnp.float32)
    p = jax.nn.softmax(s, axis=-1)
    o = jnp.einsum("bhqk,bhkv->bhqv", p, value.astype(jnp.float32))
    return o.astype(query.dtype)


if __name__ == "__main__":
    # --- case 1: module-sized inputs (per-head additive mask, single-pass path)
    B, H, Lq, Lk, E = 2, 4, 8, 8, 32
    kq, kk, kv, km = jax.random.split(jax.random.PRNGKey(0), 4)
    query = jax.random.normal(kq, (B, H, Lq, E), dtype=jnp.float32)
    key_t = jax.random.normal(kk, (B, H, Lk, E), dtype=jnp.float32)
    value = jax.random.normal(kv, (B, H, Lk, E), dtype=jnp.float32)
    mask = 0.1 * jax.random.normal(km, (B, H, Lq, Lk), dtype=jnp.float32)

    out = jax.block_until_ready(sdpa_pallas(query, key_t, value, mask))
    ref = sdpa_ref(query, key_t, value, mask)
    assert out.shape == ref.shape
    assert jnp.allclose(out, ref, atol=5e-2, rtol=5e-2), "bf16 path mismatch"

    # Exact-precision path (no bf16 cast) for tight parity with torch SDPA.
    out_f32 = jax.block_until_ready(
        sdpa_pallas(query, key_t, value, mask, compute_dtype=None))
    assert jnp.allclose(out_f32, ref, atol=2e-3, rtol=2e-3), "f32 path mismatch"

    # --- case 2: longer kv with a head-shared mask: exercises the flash
    #     (online-softmax) path, the resident shared mask, and the lane-dense
    #     (head-folded) output store.
    B2, H2, Lq2, Lk2, E2 = 2, 4, 128, 640, 32
    kq, kk, kv, km = jax.random.split(jax.random.PRNGKey(1), 4)
    q2 = jax.random.normal(kq, (B2, H2, Lq2, E2), dtype=jnp.float32)
    k2 = jax.random.normal(kk, (B2, H2, Lk2, E2), dtype=jnp.float32)
    v2 = jax.random.normal(kv, (B2, H2, Lk2, E2), dtype=jnp.float32)
    m2 = 0.1 * jax.random.normal(km, (1, 1, Lq2, Lk2), dtype=jnp.float32)

    out2 = jax.block_until_ready(sdpa_pallas(q2, k2, v2, m2))
    ref2 = sdpa_ref(q2, k2, v2, m2)
    assert jnp.allclose(out2, ref2, atol=5e-2, rtol=5e-2), "flash path mismatch"

    print("KERNEL_OK")
</pallas_src>

<mosaic_0001>
module attributes {stable_mosaic.version = 11 : i64} {
  func.func @_sdpa_single_kernel(%arg0: i32, %arg1: i32, %arg2: memref<4x8x32xbf16, #tpu.memory_space<vmem>>, %arg3: memref<4x8x32xbf16, #tpu.memory_space<vmem>>, %arg4: memref<4x8x32xbf16, #tpu.memory_space<vmem>>, %arg5: memref<4x8x8xbf16, #tpu.memory_space<vmem>>, %arg6: memref<1x8x128xf32, #tpu.memory_space<vmem>>) attributes {dimension_semantics = [#tpu.dimension_semantics<parallel>, #tpu.dimension_semantics<parallel>], iteration_bounds = array<i64: 2, 1>, scalar_prefetch = 0 : i64, scratch_operands = 0 : i64, tpu.core_type = #tpu.core_type<tc>, window_params = [{transform_indices = @transform_0, window_bounds = array<i64: 4, 8, 32>}, {transform_indices = @transform_1, window_bounds = array<i64: 4, 8, 32>}, {transform_indices = @transform_2, window_bounds = array<i64: 4, 8, 32>}, {transform_indices = @transform_3, window_bounds = array<i64: 4, 8, 8>}, {transform_indices = @transform_4, window_bounds = array<i64: 1, 8, 128>}]} {
    %c0 = arith.constant 0 : index
    %c0_0 = arith.constant 0 : index
    %c0_1 = arith.constant 0 : index
    %0 = vector.load %arg5[%c0, %c0_0, %c0_1] : memref<4x8x8xbf16, #tpu.memory_space<vmem>>, vector<4x8x8xbf16>
    %c0_2 = arith.constant 0 : index
    %c0_3 = arith.constant 0 : index
    %c0_4 = arith.constant 0 : index
    %1 = vector.load %arg2[%c0_2, %c0_3, %c0_4] : memref<4x8x32xbf16, #tpu.memory_space<vmem>>, vector<4x8x32xbf16>
    %cst = arith.constant 1.250000e-01 : bf16
    %2 = vector.broadcast %cst : bf16 to vector<4x8x32xbf16>
    %3 = arith.mulf %1, %2 : vector<4x8x32xbf16>
    %c0_5 = arith.constant 0 : index
    %c0_6 = arith.constant 0 : index
    %c0_7 = arith.constant 0 : index
    %4 = vector.load %arg3[%c0_5, %c0_6, %c0_7] : memref<4x8x32xbf16, #tpu.memory_space<vmem>>, vector<4x8x32xbf16>
    "tpu.trace_start"() <{level = 10 : i32, message = "gqe,gke->gqk"}> : () -> ()
    %cst_8 = arith.constant dense<0.000000e+00> : vector<4x8x8xf32>
    %5 = tpu.matmul %3, %4, %cst_8 {dimension_numbers = #tpu.dot_dimension_numbers<[2], [2], [1], [1], [0, 0, 0, 1, 1, 1], [0], [0]>} : vector<4x8x32xbf16>, vector<4x8x32xbf16>, vector<4x8x8xf32> -> vector<4x8x8xf32>
    "tpu.trace_stop"() : () -> ()
    %6 = arith.extf %0 : vector<4x8x8xbf16> to vector<4x8x8xf32>
    %7 = arith.addf %5, %6 : vector<4x8x8xf32>
    %cst_9 = arith.constant dense<0xFF800000> : vector<4x8xf32>
    %8 = vector.multi_reduction <maximumf>, %7, %cst_9 [2] : vector<4x8x8xf32> to vector<4x8xf32>
    %9 = vector.shape_cast %8 : vector<4x8xf32> to vector<4x8x1xf32>
    %10 = vector.broadcast %9 : vector<4x8x1xf32> to vector<4x8x8xf32>
    %11 = arith.subf %7, %10 : vector<4x8x8xf32>
    %12 = math.exp %11 : vector<4x8x8xf32>
    %cst_10 = arith.constant dense<0.000000e+00> : vector<4x8xf32>
    %13 = vector.multi_reduction <add>, %12, %cst_10 [2] : vector<4x8x8xf32> to vector<4x8xf32>
    %14 = vector.shape_cast %13 : vector<4x8xf32> to vector<4x8x1xf32>
    %15 = arith.truncf %12 : vector<4x8x8xf32> to vector<4x8x8xbf16>
    %c0_11 = arith.constant 0 : index
    %c0_12 = arith.constant 0 : index
    %c0_13 = arith.constant 0 : index
    %16 = vector.load %arg4[%c0_11, %c0_12, %c0_13] : memref<4x8x32xbf16, #tpu.memory_space<vmem>>, vector<4x8x32xbf16>
    "tpu.trace_start"() <{level = 10 : i32, message = "gqk,gkv->gqv"}> : () -> ()
    %cst_14 = arith.constant dense<0.000000e+00> : vector<4x8x32xf32>
    %17 = tpu.matmul %15, %16, %cst_14 {dimension_numbers = #tpu.dot_dimension_numbers<[2], [1], [1], [2], [0, 0, 0, 1, 1, 2], [0], [0]>} : vector<4x8x8xbf16>, vector<4x8x32xbf16>, vector<4x8x32xf32> -> vector<4x8x32xf32>
    "tpu.trace_stop"() : () -> ()
    %18 = tpu.reciprocal %14 {approx = true} : vector<4x8x1xf32> -> vector<4x8x1xf32>
    %19 = vector.broadcast %18 : vector<4x8x1xf32> to vector<4x8x32xf32>
    %20 = arith.mulf %17, %19 : vector<4x8x32xf32>
    %21 = vector.extract_strided_slice %20 {offsets = [0, 0, 0], sizes = [1, 8, 32], strides = [1, 1, 1]} : vector<4x8x32xf32> to vector<1x8x32xf32>
    %22 = vector.shape_cast %21 : vector<1x8x32xf32> to vector<8x32xf32>
    %c0_15 = arith.constant 0 : index
    %c0_16 = arith.constant 0 : index
    %c0_17 = arith.constant 0 : index
    %23 = vector.load %arg6[%c0_15, %c0_16, %c0_17] : memref<1x8x128xf32, #tpu.memory_space<vmem>>, vector<1x8x32xf32>
    %24 = vector.shape_cast %23 : vector<1x8x32xf32> to vector<8x32xf32>
    %25 = vector.shape_cast %22 : vector<8x32xf32> to vector<1x8x32xf32>
    tpu.vector_store %arg6[%c0_15, %c0_16, %c0_17], %25 {strides = array<i32>} : memref<1x8x128xf32, #tpu.memory_space<vmem>>, vector<1x8x32xf32>,
    %26 = vector.extract_strided_slice %20 {offsets = [1, 0, 0], sizes = [1, 8, 32], strides = [1, 1, 1]} : vector<4x8x32xf32> to vector<1x8x32xf32>
    %27 = vector.shape_cast %26 : vector<1x8x32xf32> to vector<8x32xf32>
    %c0_18 = arith.constant 0 : index
    %c0_19 = arith.constant 0 : index
    %c32 = arith.constant 32 : index
    %28 = vector.load %arg6[%c0_18, %c0_19, %c32] : memref<1x8x128xf32, #tpu.memory_space<vmem>>, vector<1x8x32xf32>
    %29 = vector.shape_cast %28 : vector<1x8x32xf32> to vector<8x32xf32>
    %30 = vector.shape_cast %27 : vector<8x32xf32> to vector<1x8x32xf32>
    tpu.vector_store %arg6[%c0_18, %c0_19, %c32], %30 {strides = array<i32>} : memref<1x8x128xf32, #tpu.memory_space<vmem>>, vector<1x8x32xf32>,
    %31 = vector.extract_strided_slice %20 {offsets = [2, 0, 0], sizes = [1, 8, 32], strides = [1, 1, 1]} : vector<4x8x32xf32> to vector<1x8x32xf32>
    %32 = vector.shape_cast %31 : vector<1x8x32xf32> to vector<8x32xf32>
    %c0_20 = arith.constant 0 : index
    %c0_21 = arith.constant 0 : index
    %c64 = arith.constant 64 : index
    %33 = vector.load %arg6[%c0_20, %c0_21, %c64] : memref<1x8x128xf32, #tpu.memory_space<vmem>>, vector<1x8x32xf32>
    %34 = vector.shape_cast %33 : vector<1x8x32xf32> to vector<8x32xf32>
    %35 = vector.shape_cast %32 : vector<8x32xf32> to vector<1x8x32xf32>
    tpu.vector_store %arg6[%c0_20, %c0_21, %c64], %35 {strides = array<i32>} : memref<1x8x128xf32, #tpu.memory_space<vmem>>, vector<1x8x32xf32>,
    %36 = vector.extract_strided_slice %20 {offsets = [3, 0, 0], sizes = [1, 8, 32], strides = [1, 1, 1]} : vector<4x8x32xf32> to vector<1x8x32xf32>
    %37 = vector.shape_cast %36 : vector<1x8x32xf32> to vector<8x32xf32>
    %c0_22 = arith.constant 0 : index
    %c0_23 = arith.constant 0 : index
    %c96 = arith.constant 96 : index
    %38 = vector.load %arg6[%c0_22, %c0_23, %c96] : memref<1x8x128xf32, #tpu.memory_space<vmem>>, vector<1x8x32xf32>
    %39 = vector.shape_cast %38 : vector<1x8x32xf32> to vector<8x32xf32>
    %40 = vector.shape_cast %37 : vector<8x32xf32> to vector<1x8x32xf32>
    tpu.vector_store %arg6[%c0_22, %c0_23, %c96], %40 {strides = array<i32>} : memref<1x8x128xf32, #tpu.memory_space<vmem>>, vector<1x8x32xf32>,
    return
  }
  func.func @transform_0(%arg0: i32, %arg1: i32) -> (i32, i32, i32) {
    %c0_i32 = arith.constant 0 : i32
    %c0_i32_0 = arith.constant 0 : i32
    return %arg0, %arg1, %c0_i32 : i32, i32, i32
  }
  func.func @transform_1(%arg0: i32, %arg1: i32) -> (i32, i32, i32) {
    %c0_i32 = arith.constant 0 : i32
    %c0_i32_0 = arith.constant 0 : i32
    %c0_i32_1 = arith.constant 0 : i32
    return %arg0, %c0_i32, %c0_i32_0 : i32, i32, i32
  }
  func.func @transform_2(%arg0: i32, %arg1: i32) -> (i32, i32, i32) {
    %c0_i32 = arith.constant 0 : i32
    %c0_i32_0 = arith.constant 0 : i32
    %c0_i32_1 = arith.constant 0 : i32
    return %arg0, %c0_i32, %c0_i32_0 : i32, i32, i32
  }
  func.func @transform_3(%arg0: i32, %arg1: i32) -> (i32, i32, i32) {
    %c0_i32 = arith.constant 0 : i32
    %c0_i32_0 = arith.constant 0 : i32
    return %arg0, %arg1, %c0_i32 : i32, i32, i32
  }
  func.func @transform_4(%arg0: i32, %arg1: i32) -> (i32, i32, i32) {
    %c0_i32 = arith.constant 0 : i32
    %c0_i32_0 = arith.constant 0 : i32
    return %arg0, %arg1, %c0_i32 : i32, i32, i32
  }
}

</mosaic_0001>

<bundles_post_ra>
// kernel: tpu_custom_call.1
= control target key start
LH: loop header
LB: loop body
LE: loop exit
PB: predicated region body
PF: predicated region fallthrough
CT: control target
= control target key end

     0   :  { %s1411_s0 = inlined_call_operand.hbm [shape: bf16[8,8,32], index: 0, kind: input, shape index: {}]   ;;  %s1412_s1 = inlined_call_operand.hbm [shape: bf16[8,8,32], index: 1, kind: input, shape index: {}]   ;;  %s1413_s2 = inlined_call_operand.hbm [shape: bf16[8,8,32], index: 2, kind: input, shape index: {}]   ;;  %s1414_s3 = inlined_call_operand.hbm [shape: bf16[8,8,8], index: 3, kind: input, shape index: {}]   ;;  %s1415_s4 = inlined_call_operand.hbm [shape: f32[2,8,128], index: 4, kind: output, shape index: {}]  }
   0x1   :  { %1421 = sst [smem:[#allocation20_spill]] %s1411_s0 }
   0x2   :  { %1422 = sst [smem:[#allocation21_spill]] %s1412_s1 }
   0x3   :  { %9 = vsyncpa [#allocation3], 0 }
   0x4   :  { %11 = vsyncpa [#allocation3 + $0x1], 0 }
   0x5   :  { %12 = vsyncpa [#allocation6], 0 }
   0x6   :  { %14 = vsyncpa [#allocation6 + $0x1], 0 }
   0x7   :  { %15 = vsyncpa [#allocation9], 0 }
   0x8   :  { %17 = vsyncpa [#allocation9 + $0x1], 0 }
   0x9   :  { %18 = vsyncpa [#allocation4], 0 }
   0xa   :  { %20 = vsyncpa [#allocation4 + $0x1], 0  ;;  %s1182_s15 = smov 0   ;;  %s1184_s16 = smov 0  }
   0xb   :  { %s1186_s17 = smov 0   ;;  %s1188_s18 = smov 0  }
   0xc   :  { %s1190_s19 = smov 0   ;;  %s1192_s20 = smov 0  }
   0xd LB: > { %1423 = sst [smem:[#allocation15_spill]] %s1138_s17  ;;  %s1213_s21 = sadd.s32 4294967295, %s1150_s20   ;;  %s1150_s20 = sphi %s1192_s20, %s26_s20   ;;  %s1146_s19 = sphi %s1190_s19, %s1440_s19   ;;  %s1142_s18 = sphi %s1188_s18, %s1439_s18   ;;  %s1138_s17 = sphi %s1186_s17, %s1438_s17   ;;  %s1134_s16 = sphi %s1184_s16, %s1442_s16   ;;  %s1130_s15 = sphi %s1182_s15, %s1441_s15  }
   0xe   : > { %1424 = sst [smem:[#allocation16_spill]] %s1146_s19  ;;  %s787_s22 = sadd.s32 4294967294, %s1150_s20  }
   0xf   : > { %1425 = sst [smem:[#allocation17_spill]] %s1150_s20  ;;  %s38_s23 = sadd.s32 1, %s1146_s19 }
  0x10   : > { %s47_s24 = sadd.s32 1, %s1138_s17  ;;  %p40_p0 = scmp.ge.s32.totalorder %s38_s23, 2 }
  0x11   : > { %p54_p1 = scmp.ne.s32.totalorder %s1138_s17, %s1134_s16  ;;  %p55_p2 = scmp.eq.s32.totalorder %s1150_s20, 0 }
  0x12   : > { %p60_p3 = scmp.ne.s32.totalorder %s1134_s16, %s1130_s15  ;;  %s1444_s23 = smov (%p40_p0, %s38_s23), 0 }
  0x13   : > { %1426 = sst [smem:[#allocation18_spill]] %s1444_s23  ;;  %p1225_p4 = por %p55_p2, %p54_p1 }
  0x14   : > { %p61_p5 = scmp.eq.s32.totalorder %s1213_s21, 0  ;;  %s42_s26 = ssub.s32 %s1146_s19, %s1444_s23 }
  0x15   : > { %p166_p6 = scmp.eq.s32.totalorder %s1213_s21, 1  ;;  %p45_p7 = scmp.eq.s32.totalorder %s42_s26, 0 }
  0x16   : > { %p1233_p8 = por %p61_p5, %p60_p3  ;;  %p172_p10 = scmp.eq.s32.totalorder %s787_s22, 1 }
  0x17   : > { %p1237_p9 = por %p166_p6, %p54_p1  ;;  %p789_p12 = scmp.ge.s32.totalorder %s1150_s20, 2 }
  0x18   : > { %s1242_s29 = scalar_select %p45_p7, %s1138_s17, %s47_s24  }
  0x19   : > { %p1244_p11 = por %p172_p10, %p60_p3  ;;  %p869_p13 = scmp.lt.s32.totalorder %s1150_s20, 2 }
  0x1a   : > { %1430 = sst [smem:[#allocation19_spill]] %s1242_s29  ;;  %s1251_s5 = sand.u32 1, %s1138_s17  }
  0x1b   : > { %s1254_s6 = sshll.u32 %s1251_s5, 4  ;;  %s1257_s7 = sshll.u32 %s1146_s19, 4 }
  0x1c   : > { %p1261_p0 = pnand %p869_p13, %p1225_p4  ;;  %s215_s9 = sand.u32 1, %s1150_s20  }
  0x1d   : > { %s1433_s1 = sld [smem:[#allocation21_spill]]  ;;  %s219_s14 = scalar_lea.vmem [#allocation5], %s1254_s6 }
  0x1e   : > { %s227_s22 = sshll.u32 %s219_s14, 4  ;;  %s216_s24 = scalar_lea.sflag [#allocation6], %s215_s9  ;;  %s228_s22 = int_to_ptr.vmem [resolvable:$true] %s227_s22 }
  0x1f   : > { %s1152_s25 = smov 64   ;;  %s1153_s26 = smov 4  }
  0x20   : > { %p802_p1 = scmp.ge.s32.totalorder %s1150_s20, 1  ;;  %p280_p2 = scmp.lt.s32.totalorder %s1150_s20, 3 }
  0x21   : > { %s1435_s0 = sld [smem:[#allocation20_spill]]  ;;  %s246_s11 = scalar_lea.hbm %s1413_s2, %s1257_s7 }
  0x22   : > { %p1278_p3 = pnand %p802_p1, %p280_p2  ;;  %s269_s17 = scalar_lea.hbm %s1414_s3, %s1257_s7 }
  0x23   : > { %s224_s12 = scalar_lea.hbm %s1433_s1, %s1257_s7  ;;  %s196_s1 = scalar_lea.vmem [#allocation2], %s1254_s6 }
  0x24   : > { %s225_s13 = sshll.u32 %s224_s12, 4  ;;  %s205_s23 = sshll.u32 %s196_s1, 4  ;;  %s226_s13 = int_to_ptr.hbm [resolvable:$true] %s225_s13  ;;  %s206_s23 = int_to_ptr.vmem [resolvable:$true] %s205_s23 }
  0x25   : > { %858 = dma.hbm_to_vmem [thread:$0]  (!%p1261_p0), %s226_s13, 256, %s228_s22, %s216_s24, %s1152_s25, %s1152_s25, %s1153_s26  }
  0x26   : > { %s193_s13 = scalar_lea.sflag [#allocation3], %s1251_s5  ;;  %s247_s12 = sshll.u32 %s246_s11, 4  ;;  %s248_s12 = int_to_ptr.hbm [resolvable:$true] %s247_s12 }
  0x27   : > { %s202_s9 = scalar_lea.hbm %s1435_s0, %s1257_s7  ;;  %s241_s0 = scalar_lea.vmem [#allocation7], %s1254_s6 }
  0x28   : > { %s203_s14 = sshll.u32 %s202_s9, 4  ;;  %s249_s29 = sshll.u32 %s241_s0, 4  ;;  %s204_s14 = int_to_ptr.hbm [resolvable:$true] %s203_s14  ;;  %s250_s29 = int_to_ptr.vmem [resolvable:$true] %s249_s29 }
  0x29   : > { %855 = dma.hbm_to_vmem [thread:$0]  (!%p1261_p0), %s204_s14, 256, %s206_s23, %s193_s13, %s1152_s25, %s1152_s25, %s1153_s26  }
  0x2a   : > { %861 = dma.hbm_to_vmem [thread:$0]  (!%p1261_p0), %s248_s12, 256, %s250_s29, %s216_s24, %s1152_s25, %s1152_s25, %s1153_s26  }
  0x2b   : > { %s263_s20 = scalar_lea.vmem [#allocation8], %s1254_s6  ;;  %s270_s14 = sshll.u32 %s269_s17, 4  ;;  %s271_s14 = int_to_ptr.hbm [resolvable:$true] %s270_s14 }
  0x2c   : > { %s272_s23 = sshll.u32 %s263_s20, 4  ;;  %s260_s19 = scalar_lea.sflag [#allocation9], %s1251_s5  ;;  %s273_s23 = int_to_ptr.vmem [resolvable:$true] %s272_s23 }
  0x2d   : > { %864 = dma.hbm_to_vmem [thread:$0]  (!%p1261_p0), %s271_s14, 256, %s273_s23, %s260_s19, %s1152_s25, %s1152_s25, %s1153_s26  }
  0x2e   : > { %284 = sbr.rel (%p1278_p3) target bundleno = 591 (0x24f), region = 36  ;;  %s1317_s0 = sand.u32 (!%p1278_p3), 1, %s1134_s16  }
  0x2f   : > { %s1320_s29 = sshll.u32 (!%p1278_p3), %s1317_s0, 4  ;;  %s287_s17 = scalar_lea.sflag (!%p1278_p3), [#allocation3], %s1317_s0 }
  0x30   : > { %s290_s20 = scalar_lea.vmem (!%p1278_p3), [#allocation2], %s1320_s29 }
  0x33   : > { %1113 = dma.done.wait (%p1233_p8), %s287_s17, 256  }
  0x34   : > { %1115 = vsyncadd (%p1233_p8), %s287_s17, 4294967040  ;;  %s296_s5 = sand.u32 1, %s1213_s21   ;;  %s300_s7 = scalar_lea.vmem [#allocation5], %s1320_s29 }
  0x35   : > { %s297_s6 = scalar_lea.sflag [#allocation6], %s296_s5 }
  0x36   : > { %1117 = dma.done.wait (%p1233_p8), %s297_s6, 512  }
  0x37   : > { %1119 = vsyncadd (%p1233_p8), %s297_s6, 4294966784  ;;  %s1335_s8 = scalar_lea.vmem [#allocation7], %s1320_s29  ;;  %s317_s24 = scalar_lea.sflag [#allocation9], %s1317_s0 }
  0x38   : > { %s320_s25 = scalar_lea.vmem [#allocation8], %s1320_s29 }
  0x39   : > { %1121 = dma.done.wait (%p1233_p8), %s317_s24, 256  }
  0x3a   : > { %1123 = vsyncadd (%p1233_p8), %s317_s24, 4294967040  ;;  %vm394_vm0 = vcmask 261120   ;;  %v387_v0 = vld [vmem:[%s300_s7 + $0x4] sm:$0xf]  ;;  %v388_v1 = vld [vmem:[%s300_s7 + $0x8] sm:$0xf] }
  0x3b   : > { %v389_v2 = vld [vmem:[%s300_s7 + $0xc] sm:$0xf]  ;;  %v418_v3 = vsel %vm394_vm0, %v387_v0, 0  ;;  %v437_v4 = vsel %vm394_vm0, %v388_v1, 0  ;;  %v833_v6 = vld [vmem:[%s290_s20] sm:$0xff]   ;;  %vm471_vm1 = vcmask 64512  }
  0x3c   : > { %v456_v5 = vsel %vm394_vm0, %v389_v2, 0  ;;  %v841_v7 = vld [vmem:[%s290_s20 + $0x8] sm:$0xff]   ;;  %427 = vmatpush.bf16.xpose.msra.mxu1 %v418_v3  ;;  %446 = vmatpush.bf16.xpose.msra.mxu2 %v437_v4  ;;  %v835_v8 = vunpack.c.h.bf16 %v833_v6  ;;  %v386_v11 = vld [vmem:[%s300_s7] sm:$0xf]  ;;  %v834_v12 = vunpack.c.l.bf16 %v833_v6  ;;  %v513_v44 = vld [vmem:[%s1335_s8 + $0x4] sm:$0xf] }
  0x3d   : > { %v838_v9 = vunpack.c.l.bf16 %v841_v7  ;;  %v839_v10 = vunpack.c.h.bf16 %v841_v7  ;;  %465 = vmatpush.bf16.xpose.msra.mxu3 %v456_v5  ;;  %v399_v13 = vsel %vm394_vm0, %v386_v11, 0  ;;  %v825_v22 = vld [vmem:[%s320_s25] sm:$0xff]   ;;  %v840_v25 = vld [vmem:[%s320_s25 + $0x8] sm:$0xff]   ;;  %vm519_vm2 = vcmask 1043456   ;;  %s1154_s21 = smov 32   ;;  %s807_s27 = sshll.u32 %s1317_s0, 3 }
  0x3e   : > { %v379_v14 = vmul.f32 0.125, %v835_v8  ;;  %408 = vmatpush.bf16.xpose.msra.mxu0 %v399_v13  ;;  %v378_v17 = vmul.f32 0.125, %v834_v12  ;;  %v827_v23 = vunpack.c.h.bf16 %v825_v22  ;;  %v826_v27 = vunpack.c.l.bf16 %v825_v22  ;;  %v514_v46 = vld [vmem:[%s1335_s8 + $0x8] sm:$0xf]  ;;  %v515_v47 = vld [vmem:[%s1335_s8 + $0xc] sm:$0xf] }
  0x3f   : > { %v380_v15 = vmul.f32 0.125, %v838_v9  ;;  %v381_v16 = vmul.f32 0.125, %v839_v10  ;;  %v830_v30 = vunpack.c.l.bf16 %v840_v25  ;;  %v831_v34 = vunpack.c.h.bf16 %v840_v25  ;;  %v512_v50 = vld [vmem:[%s1335_s8] sm:$0xf]  ;;  %s360_s26 = scalar_lea.vmem [#allocation10], %s807_s27  ;;  %s1155_s10 = smov 64  }
  0x40   : > { %v383_v18 = vpack.c.bf16 %v379_v14, %v379_v14  ;;  %v382_v21 = vpack.c.bf16 %v378_v17, %v378_v17  ;;  %v540_v45 = vsel %vm519_vm2, %v513_v44, 0  ;;  %v559_v48 = vsel %vm519_vm2, %v514_v46, 0  ;;  %s1156_s13 = smov 96   ;;  %s817_s22 = sshll.u32 %s1142_s18, 3 }
  0x41   : > { %v384_v19 = vpack.c.bf16 %v380_v15, %v380_v15  ;;  %v385_v20 = vpack.c.bf16 %v381_v16, %v381_v16  ;;  %v578_v49 = vsel %vm519_vm2, %v515_v47, 0  ;;  %v521_v51 = vsel %vm519_vm2, %v512_v50, 0  ;;  %s632_s1 = scalar_lea.hbm %s1415_s4, %s817_s22  ;;  %s634_s9 = sshll.u32 %s360_s26, 4  ;;  %s635_s9 = int_to_ptr.vmem [resolvable:$true] %s634_s9 }
  0x42   : > { %vm606_vm3 = vcmask 523520   ;;  %vm612_vm4 = vcmask 785920   ;;  %s636_s23 = sshll.u32 %s632_s1, 4  ;;  %vm618_vm5 = vcmask 1048320   ;;  %s621_s14 = scalar_lea.sflag [#allocation4], %s1317_s0  ;;  %s637_s23 = int_to_ptr.hbm [resolvable:$true] %s636_s23 }
  0x43   : > { %809 = vmatmul.msk.bf16.vlgmr.msra.gmra.mxu1 %vm394_vm0, %v383_v18  ;;  %810 = vmatmul.msk.bf16.vlgmr.msra.gmra.mxu2 %vm394_vm0, %v384_v19  ;;  %s1074_s19 = sshra.s32 %s637_s23, 4  ;;  %s1080_s20 = scalar_lea.hbm %s1415_s4, 16  ;;  %s1075_s19 = int_to_ptr.hbm [resolvable:$true] %s1074_s19 }
  0x44   : > { %811 = vmatmul.msk.bf16.vlgmr.msra.gmra.mxu3 %vm394_vm0, %v385_v20  ;;  %549 = vmatpush.bf16.msrb.mxu1 %v540_v45  ;;  %s1076_s29 = scalar_lea.hbm %s1075_s19, 8  ;;  %p1081_p7 = scmp.lt.s32.totalorder %s1075_s19, %s1415_s4 }
  0x45   : > { %808 = vmatmul.msk.bf16.vlgmr.msra.gmra.mxu0 %vm394_vm0, %v382_v21  ;;  %568 = vmatpush.bf16.msrb.mxu2 %v559_v48  ;;  %p1077_p4 = scmp.ne.s32.totalorder %s1075_s19, %s1076_s29  ;;  %p1082_p8 = scmp.lt.s32.totalorder %s1080_s20, %s1076_s29 }
  0x46   : > { %587 = vmatpush.bf16.msrb.mxu3 %v578_v49  ;;  %530 = vmatpush.bf16.msrb.mxu0 %v521_v51 }
  0x47   : > { %p1078_p5 = pnand %p1077_p4, %p1237_p9  ;;  %p1083_p10 = por %p1082_p8, %p1081_p7 }
  0x49   : > { %p1079_p6 = pneg %p1078_p5 }
  0x4b   : > { %p1084_p13 = pnand %p1083_p10, %p1079_p6 }
  0xc0   : > { %v429_v24 = vpop.f32.mrf.mxu1 }
  0xc1   : > { %v430_v26 = vadd.f32 %v827_v23, %v429_v24 }
  0xc2   : > { %v410_v28 = vpop.f32.mrf.mxu0 }
  0xc3   : > { %v475_v29 = vsel %vm471_vm1, %v430_v26, -inf  ;;  %v411_v31 = vadd.f32 %v826_v27, %v410_v28 }
  0xc4   : > { %476 = vmax.xlane.f32.xlu1 %v475_v29 }
  0xc5   : > { %v472_v38 = vsel %vm471_vm1, %v411_v31, -inf }
  0xc6   : > { %v448_v32 = vpop.f32.mrf.mxu2 }
  0xc7   : > { %v449_v33 = vadd.f32 %v830_v30, %v448_v32  ;;  %v467_v35 = vpop.f32.mrf.mxu3 }
  0xc8   : > { %v431_v36 = vpop.f32.mrf.mxu1  ;;  %v468_v40 = vadd.f32 %v831_v34, %v467_v35 }
  0xc9   : > { %v478_v37 = vsel %vm471_vm1, %v449_v33, -inf }
  0xca   : > { %479 = vmax.xlane.f32.xlu0 %v478_v37  ;;  %v412_v39 = vpop.f32.mrf.mxu0  ;;  %v481_v43 = vsel %vm471_vm1, %v468_v40, -inf }
  0xcc   : > { %473 = vmax.xlane.f32.xlu1 %v472_v38 }
  0xce   : > { %v450_v41 = vpop.f32.mrf.mxu2 }
  0xcf   : > { %v469_v42 = vpop.f32.mrf.mxu3 }
  0xd2   : > { %482 = vmax.xlane.f32.xlu0 %v481_v43 }
 0x137   : > { %v477_v52 = vpop.xlane.xlu1 %476 }
 0x138   : > { %v485_v53 = vsub.f32 %v430_v26, %v477_v52 }
 0x13a   : > { %v490_v54 = vmul.f32 1.442695, %v485_v53 }
 0x13c   : > { %924 = vpow2.f32 %v490_v54 }
 0x13d   : > { %v480_v55 = vpop.xlane.xlu0 %479 }
 0x13e   : > { %v486_v56 = vsub.f32 %v449_v33, %v480_v55 }
 0x13f   : > { %v474_v57 = vpop.xlane.xlu1 %473 }
 0x140   : > { %v492_v58 = vmul.f32 1.442695, %v486_v56  ;;  %v484_v59 = vsub.f32 %v411_v31, %v474_v57 }
 0x142   : > { %v925_v60 = vpop.eup %924  ;;  %926 = vpow2.f32 %v492_v58  ;;  %v488_v61 = vmul.f32 1.442695, %v484_v59 }
 0x143   : > { %v499_v62 = vsel %vm471_vm1, %v925_v60, 0.0  ;;  %v509_v63 = vpack.c.bf16 %v925_v60, %v925_v60 }
 0x144   : > { %928 = vpow2.f32 %v488_v61  ;;  %500 = vadd.xlane.f32.xlu2 %v499_v62 }
 0x145   : > { %v483_v0 = vpop.xlane.xlu0 %482  ;;  %813 = vmatmul.msk.bf16.vlgmr.msrb.gmra.mxu1 %vm471_vm1, %v509_v63 }
 0x146   : > { %v487_v1 = vsub.f32 %v468_v40, %v483_v0 }
 0x148   : > { %v927_v2 = vpop.eup %926  ;;  %v494_v3 = vmul.f32 1.442695, %v487_v1 }
 0x149   : > { %v510_v4 = vpack.c.bf16 %v927_v2, %v927_v2  ;;  %v502_v6 = vsel %vm471_vm1, %v927_v2, 0.0 }
 0x14a   : > { %v929_v5 = vpop.eup %928  ;;  %930 = vpow2.f32 %v494_v3 }
 0x14b   : > { %814 = vmatmul.msk.bf16.vlgmr.msrb.gmra.mxu2 %vm471_vm1, %v510_v4  ;;  %v496_v7 = vsel %vm471_vm1, %v929_v5, 0.0  ;;  %v508_v8 = vpack.c.bf16 %v929_v5, %v929_v5 }
 0x14c   : > { %503 = vadd.xlane.f32.xlu2 %v502_v6  ;;  %497 = vadd.xlane.f32.xlu1 %v496_v7 }
 0x14d   : > { %812 = vmatmul.msk.bf16.vlgmr.msrb.gmra.mxu0 %vm471_vm1, %v508_v8 }
 0x150   : > { %v931_v9 = vpop.eup %930 }
 0x151   : > { %v505_v10 = vsel %vm471_vm1, %v931_v9, 0.0  ;;  %v511_v11 = vpack.c.bf16 %v931_v9, %v931_v9 }
 0x152   : > { %506 = vadd.xlane.f32.xlu0 %v505_v10 }
 0x153   : > { %815 = vmatmul.msk.bf16.vlgmr.msrb.gmra.mxu3 %vm471_vm1, %v511_v11 }
 0x1b7   : > { %v501_v12 = vpop.xlane.xlu2 %500 }
 0x1b8   : > { %932 = vrcp.f32 %v501_v12 }
 0x1be   : > { %v933_v14 = vpop.eup %932 }
 0x1bf   : > { %v498_v13 = vpop.xlane.xlu1 %497  ;;  %v504_v17 = vpop.xlane.xlu2 %503 }
 0x1c0   : > { %934 = vrcp.f32 %v498_v13 }
 0x1c1   : > { %936 = vrcp.f32 %v504_v17 }
 0x1c2   : > { %v551_v15 = vpop.f32.mrf.mxu1 }
 0x1c3   : > { %v598_v16 = vmul.f32 %v933_v14, %v551_v15 }
 0x1c5   : > { %603 = vrot.lane.b32.xlu2 %v598_v16, %s1154_s21  ;;  %v507_v22 = vpop.xlane.xlu0 %506 }
 0x1c6   : > { %v935_v18 = vpop.eup %934  ;;  %938 = vrcp.f32 %v507_v22 }
 0x1c7   : > { %v937_v23 = vpop.eup %936 }
 0x1ca   : > { %v532_v19 = vpop.f32.mrf.mxu0  ;;  %v553_v20 = vpop.f32.mrf.mxu1 }
 0x1cb   : > { %v597_v21 = vmul.f32 %v935_v18, %v532_v19 }
 0x1cc   : > { %v939_v27 = vpop.eup %938 }
 0x1cd   : > { %601 = vst.msk [vmem:[%s360_s26] sm:$0xff] %vm394_vm0, %v597_v21 }
 0x1ce   : > { %v570_v24 = vpop.f32.mrf.mxu2 }
 0x1cf   : > { %v599_v25 = vmul.f32 %v937_v23, %v570_v24 }
 0x1d1   : > { %609 = vrot.lane.b32.xlu0 %v599_v25, %s1155_s10 }
 0x1d2   : > { %v534_v26 = vpop.f32.mrf.mxu0 }
 0x1d6   : > { %v572_v28 = vpop.f32.mrf.mxu2  ;;  %v589_v29 = vpop.f32.mrf.mxu3 }
 0x1d7   : > { %v600_v30 = vmul.f32 %v939_v27, %v589_v29 }
 0x1d9   : > { %615 = vrot.lane.b32.xlu1 %v600_v30, %s1156_s13 }
 0x1de   : > { %v591_v31 = vpop.f32.mrf.mxu3 }
 0x21f   : > { %v604_v32 = vpop.permute.xlu2 %603 }
 0x220   : > { %607 = vst.msk [vmem:[%s360_s26] sm:$0xff] %vm606_vm3, %v604_v32 }
 0x243   : > { %v610_v33 = vpop.permute.xlu0 %609 }
 0x244   : > { %613 = vst.msk [vmem:[%s360_s26] sm:$0xff] %vm612_vm4, %v610_v33 }
 0x24b   : > { %v616_v34 = vpop.permute.xlu1 %615 }
 0x24c   : > { %619 = vst.msk [vmem:[%s360_s26] sm:$0xff] %vm618_vm5, %v616_v34 }
 0x24d   : > { %1087 = shalt.err (!%p1084_p13)
}
 0x24e   : > { %850 = dma.vmem_to_hbm [thread:$0]  (%p1237_p9), %s635_s9, 128, %s637_s23, %s621_s14  }
 0x24f PF: > { %s1436_s0 = sld [smem:[#allocation17_spill]]  ;;  %s648_s7 = sand.u32 1, %s1130_s15  }
 0x250   : > { %p866_p0 = pnand %p789_p12, %p1244_p11  ;;  %s649_s8 = scalar_lea.sflag [#allocation4], %s648_s7 }
 0x252   : > { %p867_p1 = pneg %p866_p0 }
 0x254   : > { %1125 = dma.done.wait (%p867_p1), %s649_s8, 128  }
 0x255   : > { %1127 = vsyncadd (%p867_p1), %s649_s8, 4294967168  ;;  %s26_s20 = sadd.s32 1, %s1436_s0   ;;  %s1437_s24 = sld [smem:[#allocation15_spill]] }
 0x256   : > { %p23_p2 = scmp.ge.s32.totalorder %s26_s20, 4   ;;  %s1438_s17 = sld [smem:[#allocation19_spill]] }
 0x257   : > { %s1439_s18 = sld [smem:[#allocation16_spill]]  ;;  %s1441_s15 = smov %s1134_s16 }
 0x258   : > { %s1440_s19 = sld [smem:[#allocation18_spill]]  ;;  %25 = sbr.rel (!%p23_p2) target bundleno = 13 (0xd), region = 118 }
 0x25b   : > { %s1442_s16 = smov %s1437_s24 }
 0x25d   :  { %655 = vsyncpa [#allocation3], 1 }
 0x25e   :  { %657 = vsyncpa [#allocation3 + $0x1], 1 }
 0x25f   :  { %658 = vsyncpa [#allocation6], 1 }
 0x260   :  { %660 = vsyncpa [#allocation6 + $0x1], 1 }
 0x261   :  { %661 = vsyncpa [#allocation9], 1 }
 0x262   :  { %663 = vsyncpa [#allocation9 + $0x1], 1 }
 0x263   :  { %664 = vsyncpa [#allocation4], 1 }
 0x264   :  { %666 = vsyncpa [#allocation4 + $0x1], 1 }

</bundles_post_ra>
